<compile_context>
chip_gen: v7x
topology: tpu7x:2x2x1
jax: 0.10.0
libtpu: 0.0.40
codegen_flags: <defaults>
</compile_context>

<pallas_src>
import functools
import math

import jax
import jax.numpy as jnp
from jax.experimental import pallas as pl
from jax.experimental.pallas import tpu as pltpu

NF_NUM_LAYERS = 4  # nf_num_layers default
LOG_2PI = math.log(2.0 * math.pi)


def _softplus(x):
    # numerically stable softplus (VPU + EUP)
    return jnp.maximum(x, 0.0) + jnp.log1p(jnp.exp(-jnp.abs(x)))


def nf_latent_kernel(x_ref, eps_ref,
                     w1_ref, b1_ref, w2_ref, b2_ref,
                     whead_ref, bhead_ref,
                     uf_ref, wf_ref, bf_ref,
                     z_ref, stats_ref):
    x = x_ref[...]

    # ---------------- q_net: Linear->tanh->Linear->tanh->Dropout->Linear(fused) -----
    # TODO(synk): nn.Dropout(p=0.1) is treated as eval-mode identity (no PRNG mask / scale).
    h = jnp.tanh(jnp.dot(x.astype(jnp.bfloat16), w1_ref[...],
                         preferred_element_type=jnp.float32) + b1_ref[...])
    h = jnp.tanh(jnp.dot(h.astype(jnp.bfloat16), w2_ref[...],
                         preferred_element_type=jnp.float32) + b2_ref[...])
    # fused mu || log_sigma head: one (H, 2L) matmul, then slice at the L boundary.
    head = jnp.dot(h.astype(jnp.bfloat16), whead_ref[...],
                   preferred_element_type=jnp.float32) + bhead_ref[...]

    L = head.shape[-1] // 2
    mu = head[:, :L]
    log_sigma = head[:, L:]

    # ---------------- reparameterized base sample z0 ~ N(mu, sigma^2) ---------------
    eps = eps_ref[...]
    z = mu + jnp.exp(log_sigma) * eps

    # log q0(z0) = sum_d log N(z0_d; mu_d, sigma_d)
    log_q = (jnp.float32(-0.5 * L * LOG_2PI)
             - jnp.sum(log_sigma, axis=-1, keepdims=True)
             - 0.5 * jnp.sum(eps * eps, axis=-1, keepdims=True))            # (TM, 1)

    # ---------------- planar-flow params: z-independent, vectorized over K ----------
    uf = uf_ref[...]                                                        # (K, L)
    wf = wf_ref[...]                                                        # (K, L)
    bf = bf_ref[...]                                                        # (K, 1)
    wu = jnp.sum(wf * uf, axis=-1, keepdims=True)                           # w . u
    w_norm_sq = jnp.sum(wf * wf, axis=-1, keepdims=True)                    # ||w||^2
    # u_hat = u + (m(w.u) - w.u) * w / ||w||^2, with m(a) = -1 + softplus(a)
    u_hat = uf + ((_softplus(wu) - 1.0) - wu) * wf * pl.reciprocal(w_norm_sq, approx=True)
    wu_hat = jnp.sum(wf * u_hat, axis=-1, keepdims=True)                    # (K, 1)

    # ---------------- K planar flows: only the true z-dependency stays serialized ---
    for k in range(NF_NUM_LAYERS):
        w_k = wf[k:k + 1, :]                                                # (1, L)
        act = jnp.tanh(jnp.sum(z * w_k, axis=-1, keepdims=True)
                       + bf[k:k + 1, 0:1])                                  # (TM, 1)
        z = z + u_hat[k:k + 1, :] * act                                     # (TM, L)
        logdet = jnp.log(jnp.abs(1.0 + (1.0 - act * act)
                                 * wu_hat[k:k + 1, 0:1]) + 1e-8)
        log_q = log_q - logdet

    # ---------------- log p(z_K | x) under standard-normal prior --------------------
    log_prior = (jnp.float32(-0.5 * L * LOG_2PI)
                 - 0.5 * jnp.sum(z * z, axis=-1, keepdims=True))            # (TM, 1)

    z_ref[...] = z
    stats_ref[...] = jnp.concatenate([log_q, log_prior], axis=-1)           # (TM, 2)


def _round_up(x, m):
    return (x + m - 1) // m * m


def nf_latent_forward(nf_input, eps, params, *, tile_m=256):
    """Returns (z_K (B,L), log_q (B,), log_prior (B,))."""
    B, IN = nf_input.shape
    H = params["w1"].shape[1]
    L = params["whead"].shape[1] // 2
    K = params["u"].shape[0]

    # Row tile: fill MXU sublanes when B is large; round small batches up to sublane.
    TM = tile_m if B >= tile_m else max(8, _round_up(B, 8))
    B_pad = _round_up(B, TM)
    if B_pad != B:
        pad = B_pad - B
        nf_input = jnp.pad(nf_input, ((0, pad), (0, 0)))
        eps = jnp.pad(eps, ((0, pad), (0, 0)))

    def row_spec(cols):
        return pl.BlockSpec((TM, cols), lambda i: (i, 0))

    def const_spec(shape):
        # Constant block index -> weight DMA'd once, VMEM-resident across grid steps.
        return pl.BlockSpec(shape, lambda i: (0, 0))

    z, stats = pl.pallas_call(
        nf_latent_kernel,
        grid=(B_pad // TM,),
        out_shape=(jax.ShapeDtypeStruct((B_pad, L), jnp.float32),
                   jax.ShapeDtypeStruct((B_pad, 2), jnp.float32)),
        in_specs=[
            row_spec(IN),            # x
            row_spec(L),             # eps
            const_spec((IN, H)),     # w1 (bf16)
            const_spec((1, H)),      # b1
            const_spec((H, H)),      # w2 (bf16)
            const_spec((1, H)),      # b2
            const_spec((H, 2 * L)),  # whead (bf16, fused mu||log_sigma)
            const_spec((1, 2 * L)),  # bhead
            const_spec((K, L)),      # flow u
            const_spec((K, L)),      # flow w
            const_spec((K, 1)),      # flow bias
        ],
        out_specs=(row_spec(L), row_spec(2)),
        compiler_params=pltpu.CompilerParams(
            dimension_semantics=("parallel",)),
    )(nf_input, eps,
      params["w1"], params["b1"], params["w2"], params["b2"],
      params["whead"], params["bhead"],
      params["u"], params["w"], params["bflow"])

    return z[:B], stats[:B, 0], stats[:B, 1]


def nf_latent_reference(nf_input, eps, params):
    """Pure-JAX reference with identical numerics (bf16 dot operands, f32 accumulate)."""
    h = jnp.tanh(jnp.dot(nf_input.astype(jnp.bfloat16), params["w1"],
                         preferred_element_type=jnp.float32) + params["b1"])
    h = jnp.tanh(jnp.dot(h.astype(jnp.bfloat16), params["w2"],
                         preferred_element_type=jnp.float32) + params["b2"])
    head = jnp.dot(h.astype(jnp.bfloat16), params["whead"],
                   preferred_element_type=jnp.float32) + params["bhead"]
    L = head.shape[-1] // 2
    mu, log_sigma = head[:, :L], head[:, L:]
    z = mu + jnp.exp(log_sigma) * eps
    log_q = (-0.5 * L * LOG_2PI
             - jnp.sum(log_sigma, axis=-1)
             - 0.5 * jnp.sum(eps * eps, axis=-1))
    for k in range(NF_NUM_LAYERS):
        u = params["u"][k]
        w = params["w"][k]
        b = params["bflow"][k, 0]
        wu = jnp.sum(w * u)
        u_hat = u + ((jax.nn.softplus(wu) - 1.0) - wu) * w / jnp.sum(w * w)
        act = jnp.tanh(jnp.sum(z * w[None, :], axis=-1) + b)
        z = z + u_hat[None, :] * act[:, None]
        wu_hat = jnp.sum(w * u_hat)
        log_q = log_q - jnp.log(jnp.abs(1.0 + (1.0 - act * act) * wu_hat) + 1e-8)
    log_prior = -0.5 * L * LOG_2PI - 0.5 * jnp.sum(z * z, axis=-1)
    return z, log_q, log_prior


def init_params(key, input_size, hidden, latent, num_flows):
    """Deterministic init mimicking nn.Linear / Pyro Planar reset_parameters."""
    ks = jax.random.split(key, 9)

    def linear(kw, kb, fan_in, fan_out):
        bound = 1.0 / math.sqrt(fan_in)
        w = jax.random.uniform(kw, (fan_in, fan_out), jnp.float32, -bound, bound)
        b = jax.random.uniform(kb, (1, fan_out), jnp.float32, -bound, bound)
        return w, b

    w1, b1 = linear(ks[0], ks[1], input_size, hidden)
    w2, b2 = linear(ks[2], ks[3], hidden, hidden)
    # final Linear(hidden, 2*latent): fused mu || log_sigma head
    whead, bhead = linear(ks[4], ks[5], hidden, 2 * latent)

    stdv = 1.0 / math.sqrt(latent)
    u = jax.random.uniform(ks[6], (num_flows, latent), jnp.float32, -stdv, stdv)
    w = jax.random.uniform(ks[7], (num_flows, latent), jnp.float32, -stdv, stdv)
    bflow = jax.random.uniform(ks[8], (num_flows, 1), jnp.float32, -stdv, stdv)

    return dict(
        # q_net matmul weights in bf16 (halves weight DMA bytes, native MXU dtype);
        # biases + flow params stay f32 (used post-accumulation / on the VPU).
        w1=w1.astype(jnp.bfloat16), b1=b1,
        w2=w2.astype(jnp.bfloat16), b2=b2,
        whead=whead.astype(jnp.bfloat16), bhead=bhead,
        u=u, w=w, bflow=bflow)


if __name__ == "__main__":
    # small shapes consistent with the module: batch=8, input_size=128,
    # q_hidden_dims=[128, 128], nf_latent_size=128, nf_num_layers=4
    B, IN, H, L = 8, 128, 128, 128

    key = jax.random.PRNGKey(0)
    k_params, k_x, k_eps = jax.random.split(key, 3)

    params = init_params(k_params, IN, H, L, NF_NUM_LAYERS)
    nf_input = jax.random.normal(k_x, (B, IN), dtype=jnp.float32)
    # stochastic reparameterization noise is drawn in the wrapper and passed in
    eps = jax.random.normal(k_eps, (B, L), dtype=jnp.float32)

    z_k, log_q, log_prior = jax.jit(nf_latent_forward)(nf_input, eps, params)
    jax.block_until_ready((z_k, log_q, log_prior))

    assert z_k.shape == (B, L) and log_q.shape == (B,) and log_prior.shape == (B,)
    assert bool(jnp.all(jnp.isfinite(z_k)))
    assert bool(jnp.all(jnp.isfinite(log_q))) and bool(jnp.all(jnp.isfinite(log_prior)))

    # cross-check against a pure-JAX reference with the same numerics
    z_ref, lq_ref, lp_ref = jax.jit(nf_latent_reference)(nf_input, eps, params)
    assert bool(jnp.allclose(z_k, z_ref, rtol=1e-2, atol=1e-2))
    assert bool(jnp.allclose(log_q, lq_ref, rtol=1e-2, atol=1e-1))
    assert bool(jnp.allclose(log_prior, lp_ref, rtol=1e-2, atol=1e-1))

    print("KERNEL_OK")
</pallas_src>

<mosaic_0001>
module attributes {stable_mosaic.version = 11 : i64} {
  func.func @nf_latent_kernel(%arg0: i32, %arg1: memref<8x128xf32, #tpu.memory_space<vmem>>, %arg2: memref<8x128xf32, #tpu.memory_space<vmem>>, %arg3: memref<128x128xbf16, #tpu.memory_space<vmem>>, %arg4: memref<1x128xf32, #tpu.memory_space<vmem>>, %arg5: memref<128x128xbf16, #tpu.memory_space<vmem>>, %arg6: memref<1x128xf32, #tpu.memory_space<vmem>>, %arg7: memref<128x256xbf16, #tpu.memory_space<vmem>>, %arg8: memref<1x256xf32, #tpu.memory_space<vmem>>, %arg9: memref<4x128xf32, #tpu.memory_space<vmem>>, %arg10: memref<4x128xf32, #tpu.memory_space<vmem>>, %arg11: memref<4x1xf32, #tpu.memory_space<vmem>>, %arg12: memref<8x128xf32, #tpu.memory_space<vmem>>, %arg13: memref<8x2xf32, #tpu.memory_space<vmem>>) attributes {dimension_semantics = [#tpu.dimension_semantics<parallel>], iteration_bounds = array<i64: 1>, scalar_prefetch = 0 : i64, scratch_operands = 0 : i64, tpu.core_type = #tpu.core_type<tc>, window_params = [{transform_indices = @transform_0, window_bounds = array<i64: 8, 128>}, {transform_indices = @transform_1, window_bounds = array<i64: 8, 128>}, {pipeline_mode = #tpu.pipeline_mode<synchronous>, transform_indices = @transform_2, window_bounds = array<i64: 128, 128>}, {pipeline_mode = #tpu.pipeline_mode<synchronous>, transform_indices = @transform_3, window_bounds = array<i64: 1, 128>}, {pipeline_mode = #tpu.pipeline_mode<synchronous>, transform_indices = @transform_4, window_bounds = array<i64: 128, 128>}, {pipeline_mode = #tpu.pipeline_mode<synchronous>, transform_indices = @transform_5, window_bounds = array<i64: 1, 128>}, {pipeline_mode = #tpu.pipeline_mode<synchronous>, transform_indices = @transform_6, window_bounds = array<i64: 128, 256>}, {pipeline_mode = #tpu.pipeline_mode<synchronous>, transform_indices = @transform_7, window_bounds = array<i64: 1, 256>}, {pipeline_mode = #tpu.pipeline_mode<synchronous>, transform_indices = @transform_8, window_bounds = array<i64: 4, 128>}, {pipeline_mode = #tpu.pipeline_mode<synchronous>, transform_indices = @transform_9, window_bounds = array<i64: 4, 128>}, {pipeline_mode = #tpu.pipeline_mode<synchronous>, transform_indices = @transform_10, window_bounds = array<i64: 4, 1>}, {transform_indices = @transform_11, window_bounds = array<i64: 8, 128>}, {transform_indices = @transform_12, window_bounds = array<i64: 8, 2>}]} {
    %c0 = arith.constant 0 : index
    %c0_0 = arith.constant 0 : index
    %0 = vector.load %arg1[%c0, %c0_0] : memref<8x128xf32, #tpu.memory_space<vmem>>, vector<8x128xf32>
    %1 = arith.truncf %0 : vector<8x128xf32> to vector<8x128xbf16>
    %c0_1 = arith.constant 0 : index
    %c0_2 = arith.constant 0 : index
    %2 = vector.load %arg3[%c0_1, %c0_2] : memref<128x128xbf16, #tpu.memory_space<vmem>>, vector<128x128xbf16>
    %cst = arith.constant dense<0.000000e+00> : vector<8x128xf32>
    %3 = tpu.matmul %1, %2, %cst {dimension_numbers = #tpu.dot_dimension_numbers<[1], [0], [0], [1], [0, 0, 1, 1], [], []>} : vector<8x128xbf16>, vector<128x128xbf16>, vector<8x128xf32> -> vector<8x128xf32>
    %c0_3 = arith.constant 0 : index
    %c0_4 = arith.constant 0 : index
    %4 = vector.load %arg4[%c0_3, %c0_4] : memref<1x128xf32, #tpu.memory_space<vmem>>, vector<1x128xf32>
    %5 = vector.broadcast %4 : vector<1x128xf32> to vector<8x128xf32>
    %6 = arith.addf %3, %5 : vector<8x128xf32>
    %7 = math.tanh %6 : vector<8x128xf32>
    %8 = arith.truncf %7 : vector<8x128xf32> to vector<8x128xbf16>
    %c0_5 = arith.constant 0 : index
    %c0_6 = arith.constant 0 : index
    %9 = vector.load %arg5[%c0_5, %c0_6] : memref<128x128xbf16, #tpu.memory_space<vmem>>, vector<128x128xbf16>
    %cst_7 = arith.constant dense<0.000000e+00> : vector<8x128xf32>
    %10 = tpu.matmul %8, %9, %cst_7 {dimension_numbers = #tpu.dot_dimension_numbers<[1], [0], [0], [1], [0, 0, 1, 1], [], []>} : vector<8x128xbf16>, vector<128x128xbf16>, vector<8x128xf32> -> vector<8x128xf32>
    %c0_8 = arith.constant 0 : index
    %c0_9 = arith.constant 0 : index
    %11 = vector.load %arg6[%c0_8, %c0_9] : memref<1x128xf32, #tpu.memory_space<vmem>>, vector<1x128xf32>
    %12 = vector.broadcast %11 : vector<1x128xf32> to vector<8x128xf32>
    %13 = arith.addf %10, %12 : vector<8x128xf32>
    %14 = math.tanh %13 : vector<8x128xf32>
    %15 = arith.truncf %14 : vector<8x128xf32> to vector<8x128xbf16>
    %c0_10 = arith.constant 0 : index
    %c0_11 = arith.constant 0 : index
    %16 = vector.load %arg7[%c0_10, %c0_11] : memref<128x256xbf16, #tpu.memory_space<vmem>>, vector<128x256xbf16>
    %cst_12 = arith.constant dense<0.000000e+00> : vector<8x256xf32>
    %17 = tpu.matmul %15, %16, %cst_12 {dimension_numbers = #tpu.dot_dimension_numbers<[1], [0], [0], [1], [0, 0, 1, 1], [], []>} : vector<8x128xbf16>, vector<128x256xbf16>, vector<8x256xf32> -> vector<8x256xf32>
    %c0_13 = arith.constant 0 : index
    %c0_14 = arith.constant 0 : index
    %18 = vector.load %arg8[%c0_13, %c0_14] : memref<1x256xf32, #tpu.memory_space<vmem>>, vector<1x256xf32>
    %19 = vector.broadcast %18 : vector<1x256xf32> to vector<8x256xf32>
    %20 = arith.addf %17, %19 : vector<8x256xf32>
    %21 = vector.extract_strided_slice %20 {offsets = [0, 0], sizes = [8, 128], strides = [1, 1]} : vector<8x256xf32> to vector<8x128xf32>
    %22 = vector.extract_strided_slice %20 {offsets = [0, 128], sizes = [8, 128], strides = [1, 1]} : vector<8x256xf32> to vector<8x128xf32>
    %c0_15 = arith.constant 0 : index
    %c0_16 = arith.constant 0 : index
    %23 = vector.load %arg2[%c0_15, %c0_16] : memref<8x128xf32, #tpu.memory_space<vmem>>, vector<8x128xf32>
    %24 = math.exp %22 : vector<8x128xf32>
    %25 = arith.mulf %24, %23 : vector<8x128xf32>
    %26 = arith.addf %21, %25 : vector<8x128xf32>
    %cst_17 = arith.constant dense<0.000000e+00> : vector<8xf32>
    %27 = vector.multi_reduction <add>, %22, %cst_17 [1] : vector<8x128xf32> to vector<8xf32>
    %28 = vector.shape_cast %27 : vector<8xf32> to vector<8x1xf32>
    %cst_18 = arith.constant -117.62413 : f32
    %29 = vector.broadcast %cst_18 : f32 to vector<8x1xf32>
    %30 = arith.subf %29, %28 : vector<8x1xf32>
    %31 = arith.mulf %23, %23 : vector<8x128xf32>
    %cst_19 = arith.constant dense<0.000000e+00> : vector<8xf32>
    %32 = vector.multi_reduction <add>, %31, %cst_19 [1] : vector<8x128xf32> to vector<8xf32>
    %33 = vector.shape_cast %32 : vector<8xf32> to vector<8x1xf32>
    %cst_20 = arith.constant 5.000000e-01 : f32
    %34 = vector.broadcast %cst_20 : f32 to vector<8x1xf32>
    %35 = arith.mulf %34, %33 : vector<8x1xf32>
    %36 = arith.subf %30, %35 : vector<8x1xf32>
    %c0_21 = arith.constant 0 : index
    %c0_22 = arith.constant 0 : index
    %37 = vector.load %arg9[%c0_21, %c0_22] : memref<4x128xf32, #tpu.memory_space<vmem>>, vector<4x128xf32>
    %c0_23 = arith.constant 0 : index
    %c0_24 = arith.constant 0 : index
    %38 = vector.load %arg10[%c0_23, %c0_24] : memref<4x128xf32, #tpu.memory_space<vmem>>, vector<4x128xf32>
    %c0_25 = arith.constant 0 : index
    %c0_26 = arith.constant 0 : index
    %39 = vector.load %arg11[%c0_25, %c0_26] : memref<4x1xf32, #tpu.memory_space<vmem>>, vector<4x1xf32>
    %40 = arith.mulf %38, %37 : vector<4x128xf32>
    %cst_27 = arith.constant dense<0.000000e+00> : vector<4xf32>
    %41 = vector.multi_reduction <add>, %40, %cst_27 [1] : vector<4x128xf32> to vector<4xf32>
    %42 = vector.shape_cast %41 : vector<4xf32> to vector<4x1xf32>
    %43 = arith.mulf %38, %38 : vector<4x128xf32>
    %cst_28 = arith.constant dense<0.000000e+00> : vector<4xf32>
    %44 = vector.multi_reduction <add>, %43, %cst_28 [1] : vector<4x128xf32> to vector<4xf32>
    %45 = vector.shape_cast %44 : vector<4xf32> to vector<4x1xf32>
    %cst_29 = arith.constant 0.000000e+00 : f32
    %46 = vector.broadcast %cst_29 : f32 to vector<4x1xf32>
    %47 = arith.maximumf %42, %46 : vector<4x1xf32>
    %48 = math.absf %42 : vector<4x1xf32>
    %cst_30 = arith.constant 0.000000e+00 : f32
    %49 = vector.broadcast %cst_30 : f32 to vector<4x1xf32>
    %50 = arith.subf %49, %48 : vector<4x1xf32>
    %51 = math.exp %50 : vector<4x1xf32>
    %52 = math.log1p %51 : vector<4x1xf32>
    %53 = arith.addf %47, %52 : vector<4x1xf32>
    %cst_31 = arith.constant 1.000000e+00 : f32
    %54 = vector.broadcast %cst_31 : f32 to vector<4x1xf32>
    %55 = arith.subf %53, %54 : vector<4x1xf32>
    %56 = arith.subf %55, %42 : vector<4x1xf32>
    %57 = vector.broadcast %56 : vector<4x1xf32> to vector<4x128xf32>
    %58 = arith.mulf %57, %38 : vector<4x128xf32>
    %59 = tpu.reciprocal %45 {approx = true} : vector<4x1xf32> -> vector<4x1xf32>
    %60 = vector.broadcast %59 : vector<4x1xf32> to vector<4x128xf32>
    %61 = arith.mulf %58, %60 : vector<4x128xf32>
    %62 = arith.addf %37, %61 : vector<4x128xf32>
    %63 = arith.mulf %38, %62 : vector<4x128xf32>
    %cst_32 = arith.constant dense<0.000000e+00> : vector<4xf32>
    %64 = vector.multi_reduction <add>, %63, %cst_32 [1] : vector<4x128xf32> to vector<4xf32>
    %65 = vector.shape_cast %64 : vector<4xf32> to vector<4x1xf32>
    %66 = vector.extract_strided_slice %38 {offsets = [0, 0], sizes = [1, 128], strides = [1, 1]} : vector<4x128xf32> to vector<1x128xf32>
    %67 = vector.broadcast %66 : vector<1x128xf32> to vector<8x128xf32>
    %68 = arith.mulf %26, %67 : vector<8x128xf32>
    %cst_33 = arith.constant dense<0.000000e+00> : vector<8xf32>
    %69 = vector.multi_reduction <add>, %68, %cst_33 [1] : vector<8x128xf32> to vector<8xf32>
    %70 = vector.shape_cast %69 : vector<8xf32> to vector<8x1xf32>
    %71 = vector.extract_strided_slice %39 {offsets = [0, 0], sizes = [1, 1], strides = [1, 1]} : vector<4x1xf32> to vector<1x1xf32>
    %72 = vector.broadcast %71 : vector<1x1xf32> to vector<8x1xf32>
    %73 = arith.addf %70, %72 : vector<8x1xf32>
    %74 = math.tanh %73 : vector<8x1xf32>
    %75 = vector.extract_strided_slice %62 {offsets = [0, 0], sizes = [1, 128], strides = [1, 1]} : vector<4x128xf32> to vector<1x128xf32>
    %76 = vector.broadcast %75 : vector<1x128xf32> to vector<8x128xf32>
    %77 = vector.broadcast %74 : vector<8x1xf32> to vector<8x128xf32>
    %78 = arith.mulf %76, %77 : vector<8x128xf32>
    %79 = arith.addf %26, %78 : vector<8x128xf32>
    %80 = arith.mulf %74, %74 : vector<8x1xf32>
    %cst_34 = arith.constant 1.000000e+00 : f32
    %81 = vector.broadcast %cst_34 : f32 to vector<8x1xf32>
    %82 = arith.subf %81, %80 : vector<8x1xf32>
    %83 = vector.extract_strided_slice %65 {offsets = [0, 0], sizes = [1, 1], strides = [1, 1]} : vector<4x1xf32> to vector<1x1xf32>
    %84 = vector.broadcast %83 : vector<1x1xf32> to vector<8x1xf32>
    %85 = arith.mulf %82, %84 : vector<8x1xf32>
    %cst_35 = arith.constant 1.000000e+00 : f32
    %86 = vector.broadcast %cst_35 : f32 to vector<8x1xf32>
    %87 = arith.addf %86, %85 : vector<8x1xf32>
    %88 = math.absf %87 : vector<8x1xf32>
    %cst_36 = arith.constant 9.99999993E-9 : f32
    %89 = vector.broadcast %cst_36 : f32 to vector<8x1xf32>
    %90 = arith.addf %88, %89 : vector<8x1xf32>
    %91 = math.log %90 : vector<8x1xf32>
    %92 = arith.subf %36, %91 : vector<8x1xf32>
    %93 = vector.extract_strided_slice %38 {offsets = [1, 0], sizes = [1, 128], strides = [1, 1]} : vector<4x128xf32> to vector<1x128xf32>
    %94 = vector.broadcast %93 : vector<1x128xf32> to vector<8x128xf32>
    %95 = arith.mulf %79, %94 : vector<8x128xf32>
    %cst_37 = arith.constant dense<0.000000e+00> : vector<8xf32>
    %96 = vector.multi_reduction <add>, %95, %cst_37 [1] : vector<8x128xf32> to vector<8xf32>
    %97 = vector.shape_cast %96 : vector<8xf32> to vector<8x1xf32>
    %98 = vector.extract_strided_slice %39 {offsets = [1, 0], sizes = [1, 1], strides = [1, 1]} : vector<4x1xf32> to vector<1x1xf32>
    %99 = vector.broadcast %98 : vector<1x1xf32> to vector<8x1xf32>
    %100 = arith.addf %97, %99 : vector<8x1xf32>
    %101 = math.tanh %100 : vector<8x1xf32>
    %102 = vector.extract_strided_slice %62 {offsets = [1, 0], sizes = [1, 128], strides = [1, 1]} : vector<4x128xf32> to vector<1x128xf32>
    %103 = vector.broadcast %102 : vector<1x128xf32> to vector<8x128xf32>
    %104 = vector.broadcast %101 : vector<8x1xf32> to vector<8x128xf32>
    %105 = arith.mulf %103, %104 : vector<8x128xf32>
    %106 = arith.addf %79, %105 : vector<8x128xf32>
    %107 = arith.mulf %101, %101 : vector<8x1xf32>
    %cst_38 = arith.constant 1.000000e+00 : f32
    %108 = vector.broadcast %cst_38 : f32 to vector<8x1xf32>
    %109 = arith.subf %108, %107 : vector<8x1xf32>
    %110 = vector.extract_strided_slice %65 {offsets = [1, 0], sizes = [1, 1], strides = [1, 1]} : vector<4x1xf32> to vector<1x1xf32>
    %111 = vector.broadcast %110 : vector<1x1xf32> to vector<8x1xf32>
    %112 = arith.mulf %109, %111 : vector<8x1xf32>
    %cst_39 = arith.constant 1.000000e+00 : f32
    %113 = vector.broadcast %cst_39 : f32 to vector<8x1xf32>
    %114 = arith.addf %113, %112 : vector<8x1xf32>
    %115 = math.absf %114 : vector<8x1xf32>
    %cst_40 = arith.constant 9.99999993E-9 : f32
    %116 = vector.broadcast %cst_40 : f32 to vector<8x1xf32>
    %117 = arith.addf %115, %116 : vector<8x1xf32>
    %118 = math.log %117 : vector<8x1xf32>
    %119 = arith.subf %92, %118 : vector<8x1xf32>
    %120 = vector.extract_strided_slice %38 {offsets = [2, 0], sizes = [1, 128], strides = [1, 1]} : vector<4x128xf32> to vector<1x128xf32>
    %121 = vector.broadcast %120 : vector<1x128xf32> to vector<8x128xf32>
    %122 = arith.mulf %106, %121 : vector<8x128xf32>
    %cst_41 = arith.constant dense<0.000000e+00> : vector<8xf32>
    %123 = vector.multi_reduction <add>, %122, %cst_41 [1] : vector<8x128xf32> to vector<8xf32>
    %124 = vector.shape_cast %123 : vector<8xf32> to vector<8x1xf32>
    %125 = vector.extract_strided_slice %39 {offsets = [2, 0], sizes = [1, 1], strides = [1, 1]} : vector<4x1xf32> to vector<1x1xf32>
    %126 = vector.broadcast %125 : vector<1x1xf32> to vector<8x1xf32>
    %127 = arith.addf %124, %126 : vector<8x1xf32>
    %128 = math.tanh %127 : vector<8x1xf32>
    %129 = vector.extract_strided_slice %62 {offsets = [2, 0], sizes = [1, 128], strides = [1, 1]} : vector<4x128xf32> to vector<1x128xf32>
    %130 = vector.broadcast %129 : vector<1x128xf32> to vector<8x128xf32>
    %131 = vector.broadcast %128 : vector<8x1xf32> to vector<8x128xf32>
    %132 = arith.mulf %130, %131 : vector<8x128xf32>
    %133 = arith.addf %106, %132 : vector<8x128xf32>
    %134 = arith.mulf %128, %128 : vector<8x1xf32>
    %cst_42 = arith.constant 1.000000e+00 : f32
    %135 = vector.broadcast %cst_42 : f32 to vector<8x1xf32>
    %136 = arith.subf %135, %134 : vector<8x1xf32>
    %137 = vector.extract_strided_slice %65 {offsets = [2, 0], sizes = [1, 1], strides = [1, 1]} : vector<4x1xf32> to vector<1x1xf32>
    %138 = vector.broadcast %137 : vector<1x1xf32> to vector<8x1xf32>
    %139 = arith.mulf %136, %138 : vector<8x1xf32>
    %cst_43 = arith.constant 1.000000e+00 : f32
    %140 = vector.broadcast %cst_43 : f32 to vector<8x1xf32>
    %141 = arith.addf %140, %139 : vector<8x1xf32>
    %142 = math.absf %141 : vector<8x1xf32>
    %cst_44 = arith.constant 9.99999993E-9 : f32
    %143 = vector.broadcast %cst_44 : f32 to vector<8x1xf32>
    %144 = arith.addf %142, %143 : vector<8x1xf32>
    %145 = math.log %144 : vector<8x1xf32>
    %146 = arith.subf %119, %145 : vector<8x1xf32>
    %147 = vector.extract_strided_slice %38 {offsets = [3, 0], sizes = [1, 128], strides = [1, 1]} : vector<4x128xf32> to vector<1x128xf32>
    %148 = vector.broadcast %147 : vector<1x128xf32> to vector<8x128xf32>
    %149 = arith.mulf %133, %148 : vector<8x128xf32>
    %cst_45 = arith.constant dense<0.000000e+00> : vector<8xf32>
    %150 = vector.multi_reduction <add>, %149, %cst_45 [1] : vector<8x128xf32> to vector<8xf32>
    %151 = vector.shape_cast %150 : vector<8xf32> to vector<8x1xf32>
    %152 = vector.extract_strided_slice %39 {offsets = [3, 0], sizes = [1, 1], strides = [1, 1]} : vector<4x1xf32> to vector<1x1xf32>
    %153 = vector.broadcast %152 : vector<1x1xf32> to vector<8x1xf32>
    %154 = arith.addf %151, %153 : vector<8x1xf32>
    %155 = math.tanh %154 : vector<8x1xf32>
    %156 = vector.extract_strided_slice %62 {offsets = [3, 0], sizes = [1, 128], strides = [1, 1]} : vector<4x128xf32> to vector<1x128xf32>
    %157 = vector.broadcast %156 : vector<1x128xf32> to vector<8x128xf32>
    %158 = vector.broadcast %155 : vector<8x1xf32> to vector<8x128xf32>
    %159 = arith.mulf %157, %158 : vector<8x128xf32>
    %160 = arith.addf %133, %159 : vector<8x128xf32>
    %161 = arith.mulf %155, %155 : vector<8x1xf32>
    %cst_46 = arith.constant 1.000000e+00 : f32
    %162 = vector.broadcast %cst_46 : f32 to vector<8x1xf32>
    %163 = arith.subf %162, %161 : vector<8x1xf32>
    %164 = vector.extract_strided_slice %65 {offsets = [3, 0], sizes = [1, 1], strides = [1, 1]} : vector<4x1xf32> to vector<1x1xf32>
    %165 = vector.broadcast %164 : vector<1x1xf32> to vector<8x1xf32>
    %166 = arith.mulf %163, %165 : vector<8x1xf32>
    %cst_47 = arith.constant 1.000000e+00 : f32
    %167 = vector.broadcast %cst_47 : f32 to vector<8x1xf32>
    %168 = arith.addf %167, %166 : vector<8x1xf32>
    %169 = math.absf %168 : vector<8x1xf32>
    %cst_48 = arith.constant 9.99999993E-9 : f32
    %170 = vector.broadcast %cst_48 : f32 to vector<8x1xf32>
    %171 = arith.addf %169, %170 : vector<8x1xf32>
    %172 = math.log %171 : vector<8x1xf32>
    %173 = arith.subf %146, %172 : vector<8x1xf32>
    %174 = arith.mulf %160, %160 : vector<8x128xf32>
    %cst_49 = arith.constant dense<0.000000e+00> : vector<8xf32>
    %175 = vector.multi_reduction <add>, %174, %cst_49 [1] : vector<8x128xf32> to vector<8xf32>
    %176 = vector.shape_cast %175 : vector<8xf32> to vector<8x1xf32>
    %cst_50 = arith.constant 5.000000e-01 : f32
    %177 = vector.broadcast %cst_50 : f32 to vector<8x1xf32>
    %178 = arith.mulf %177, %176 : vector<8x1xf32>
    %cst_51 = arith.constant -117.62413 : f32
    %179 = vector.broadcast %cst_51 : f32 to vector<8x1xf32>
    %180 = arith.subf %179, %178 : vector<8x1xf32>
    %c0_52 = arith.constant 0 : index
    %c0_53 = arith.constant 0 : index
    %181 = vector.load %arg12[%c0_52, %c0_53] : memref<8x128xf32, #tpu.memory_space<vmem>>, vector<8x128xf32>
    tpu.vector_store %arg12[%c0_52, %c0_53], %160 {strides = array<i32>} : memref<8x128xf32, #tpu.memory_space<vmem>>, vector<8x128xf32>,
    %182 = tpu.concatenate %173, %180 in 1 : vector<8x1xf32>, vector<8x1xf32> -> vector<8x2xf32>
    %c0_54 = arith.constant 0 : index
    %c0_55 = arith.constant 0 : index
    %183 = vector.load %arg13[%c0_54, %c0_55] : memref<8x2xf32, #tpu.memory_space<vmem>>, vector<8x2xf32>
    tpu.vector_store %arg13[%c0_54, %c0_55], %182 {strides = array<i32>} : memref<8x2xf32, #tpu.memory_space<vmem>>, vector<8x2xf32>,
    return
  }
  func.func @transform_0(%arg0: i32) -> (i32, i32) {
    %c0_i32 = arith.constant 0 : i32
    %c0_i32_0 = arith.constant 0 : i32
    return %arg0, %c0_i32 : i32, i32
  }
  func.func @transform_1(%arg0: i32) -> (i32, i32) {
    %c0_i32 = arith.constant 0 : i32
    %c0_i32_0 = arith.constant 0 : i32
    return %arg0, %c0_i32 : i32, i32
  }
  func.func @transform_2(%arg0: i32) -> (i32, i32) {
    %c0_i32 = arith.constant 0 : i32
    %c0_i32_0 = arith.constant 0 : i32
    %c0_i32_1 = arith.constant 0 : i32
    return %c0_i32, %c0_i32_0 : i32, i32
  }
  func.func @transform_3(%arg0: i32) -> (i32, i32) {
    %c0_i32 = arith.constant 0 : i32
    %c0_i32_0 = arith.constant 0 : i32
    %c0_i32_1 = arith.constant 0 : i32
    return %c0_i32, %c0_i32_0 : i32, i32
  }
  func.func @transform_4(%arg0: i32) -> (i32, i32) {
    %c0_i32 = arith.constant 0 : i32
    %c0_i32_0 = arith.constant 0 : i32
    %c0_i32_1 = arith.constant 0 : i32
    return %c0_i32, %c0_i32_0 : i32, i32
  }
  func.func @transform_5(%arg0: i32) -> (i32, i32) {
    %c0_i32 = arith.constant 0 : i32
    %c0_i32_0 = arith.constant 0 : i32
    %c0_i32_1 = arith.constant 0 : i32
    return %c0_i32, %c0_i32_0 : i32, i32
  }
  func.func @transform_6(%arg0: i32) -> (i32, i32) {
    %c0_i32 = arith.constant 0 : i32
    %c0_i32_0 = arith.constant 0 : i32
    %c0_i32_1 = arith.constant 0 : i32
    return %c0_i32, %c0_i32_0 : i32, i32
  }
  func.func @transform_7(%arg0: i32) -> (i32, i32) {
    %c0_i32 = arith.constant 0 : i32
    %c0_i32_0 = arith.constant 0 : i32
    %c0_i32_1 = arith.constant 0 : i32
    return %c0_i32, %c0_i32_0 : i32, i32
  }
  func.func @transform_8(%arg0: i32) -> (i32, i32) {
    %c0_i32 = arith.constant 0 : i32
    %c0_i32_0 = arith.constant 0 : i32
    %c0_i32_1 = arith.constant 0 : i32
    return %c0_i32, %c0_i32_0 : i32, i32
  }
  func.func @transform_9(%arg0: i32) -> (i32, i32) {
    %c0_i32 = arith.constant 0 : i32
    %c0_i32_0 = arith.constant 0 : i32
    %c0_i32_1 = arith.constant 0 : i32
    return %c0_i32, %c0_i32_0 : i32, i32
  }
  func.func @transform_10(%arg0: i32) -> (i32, i32) {
    %c0_i32 = arith.constant 0 : i32
    %c0_i32_0 = arith.constant 0 : i32
    %c0_i32_1 = arith.constant 0 : i32
    return %c0_i32, %c0_i32_0 : i32, i32
  }
  func.func @transform_11(%arg0: i32) -> (i32, i32) {
    %c0_i32 = arith.constant 0 : i32
    %c0_i32_0 = arith.constant 0 : i32
    return %arg0, %c0_i32 : i32, i32
  }
  func.func @transform_12(%arg0: i32) -> (i32, i32) {
    %c0_i32 = arith.constant 0 : i32
    %c0_i32_0 = arith.constant 0 : i32
    return %arg0, %c0_i32 : i32, i32
  }
}

</mosaic_0001>

<bundles_post_ra>
// kernel: nf_latent_forward.1
= control target key start
LH: loop header
LB: loop body
LE: loop exit
PB: predicated region body
PF: predicated region fallthrough
CT: control target
= control target key end

     0   :  { %18 = vsyncpa [#allocation3], 0  ;;  %s1301_s0 = inlined_call_operand.hbm [shape: f32[8,128], index: 0, kind: input, shape index: {}]   ;;  %s1302_s1 = inlined_call_operand.vmem [shape: f32[8,128], index: 1, kind: input, shape index: {}]   ;;  %s1303_s2 = inlined_call_operand.hbm [shape: bf16[128,128], index: 2, kind: input, shape index: {}]   ;;  %s1304_s3 = inlined_call_operand.hbm [shape: f32[1,128], index: 3, kind: input, shape index: {}]   ;;  %s1305_s4 = inlined_call_operand.hbm [shape: bf16[128,128], index: 4, kind: input, shape index: {}]   ;;  %s1306_s5 = inlined_call_operand.hbm [shape: f32[1,128], index: 5, kind: input, shape index: {}]   ;;  %s1307_s6 = inlined_call_operand.hbm [shape: bf16[128,256], index: 6, kind: input, shape index: {}]   ;;  %s1308_s7 = inlined_call_operand.vmem [shape: f32[1,256], index: 7, kind: input, shape index: {}]   ;;  %s1309_s8 = inlined_call_operand.vmem [shape: f32[4,128], index: 8, kind: input, shape index: {}]   ;;  %s1310_s9 = inlined_call_operand.vmem [shape: f32[4,128], index: 9, kind: input, shape index: {}]   ;;  %s1311_s10 = inlined_call_operand.vmem [shape: f32[4,1], index: 10, kind: input, shape index: {}]   ;;  %s1312_s11 = inlined_call_operand.hbm [shape: f32[8,128], index: 11, kind: output, shape index: {0}]   ;;  %s1313_s12 = inlined_call_operand.vmem [shape: f32[8,2], index: 12, kind: output, shape index: {1}]  }
   0x1   :  { %19 = vsyncpa [#allocation6], 0 }
   0x2   :  { %20 = vsyncpa [#allocation9], 0 }
   0x3   :  { %21 = vsyncpa [#allocation12], 0 }
   0x4   :  { %22 = vsyncpa [#allocation4], 0  ;;  %s1066_s21 = smov [#allocation5]   ;;  %s902_s25 = scalar_lea.hbm %s1303_s2, 1024 }
   0x5   :  { %s40_s22 = sshll.u32 %s1066_s21, 4  ;;  %p903_p0 = scmp.ne.s32.totalorder %s1303_s2, %s902_s25  ;;  %s41_s22 = int_to_ptr.vmem [resolvable:$true] %s40_s22 }
   0x6   :  { %p906_p1 = scmp.lt.u32.totalorder %s902_s25, %s1303_s2 }
   0x8   :  { %p908_p2 = pnand %p906_p1, %p903_p0 }
   0xa   :  { %911 = shalt.err (!%p908_p2)
}
   0xb   :  { %s912_s30 = scalar_lea.vmem %s41_s22, 1024  ;;  %p917_p4 = scmp.lt.s32.totalorder %s41_s22, %s41_s22 }
   0xc   :  { %p913_p3 = scmp.ne.s32.totalorder %s41_s22, %s912_s30  ;;  %p918_p5 = scmp.lt.s32.totalorder %s912_s30, %s912_s30 }
   0xe   :  { %p919_p6 = por %p918_p5, %p917_p4 }
  0x10   :  { %p920_p7 = pnand %p919_p6, %p913_p3 }
  0x12   :  { %923 = shalt.err (!%p920_p7)
}
  0x13   :  { %s1067_s13 = smov 64   ;;  %s1068_s14 = smov 4  }
  0x14   :  { %46 = dma.hbm_to_vmem [thread:$0]  %s1303_s2, 1024, %s41_s22, [#allocation6], %s1067_s13, %s1067_s13, %s1068_s14  }
  0x15   :  { %s1069_s17 = smov [#allocation8]   ;;  %s1070_s19 = smov [#allocation2]  }
  0x16   :  { %s62_s18 = sshll.u32 %s1069_s17, 4  ;;  %s29_s20 = sshll.u32 %s1070_s19, 4  ;;  %s63_s18 = int_to_ptr.vmem [resolvable:$true] %s62_s18  ;;  %s30_s20 = int_to_ptr.vmem [resolvable:$true] %s29_s20 }
  0x17   :  { %s924_s24 = scalar_lea.hbm %s1305_s4, 1024 }
  0x18   :  { %p925_p8 = scmp.ne.s32.totalorder %s1305_s4, %s924_s24  ;;  %p928_p9 = scmp.lt.u32.totalorder %s924_s24, %s1305_s4 }
  0x1a   :  { %p930_p10 = pnand %p928_p9, %p925_p8 }
  0x1c   :  { %933 = shalt.err (!%p930_p10)
}
  0x1d   :  { %s934_s2 = scalar_lea.vmem %s63_s18, 1024  ;;  %p939_p12 = scmp.lt.s32.totalorder %s63_s18, %s63_s18 }
  0x1e   :  { %p935_p11 = scmp.ne.s32.totalorder %s63_s18, %s934_s2  ;;  %p940_p13 = scmp.lt.s32.totalorder %s934_s2, %s934_s2 }
  0x20   :  { %p941_p0 = por %p940_p13, %p939_p12 }
  0x22   :  { %p942_p1 = pnand %p941_p0, %p935_p11 }
  0x24   :  { %945 = shalt.err (!%p942_p1)
}
  0x25   :  { %68 = dma.hbm_to_vmem [thread:$0]  %s1305_s4, 1024, %s63_s18, [#allocation9], %s1067_s13, %s1067_s13, %s1068_s14  }
  0x26   :  { %s946_s16 = scalar_lea.hbm %s1301_s0, 128 }
  0x27   :  { %p947_p2 = scmp.ne.s32.totalorder %s1301_s0, %s946_s16  ;;  %p950_p3 = scmp.lt.u32.totalorder %s946_s16, %s1301_s0 }
  0x29   :  { %p952_p4 = pnand %p950_p3, %p947_p2 }
  0x2b   :  { %955 = shalt.err (!%p952_p4)
}
  0x2c   :  { %s956_s24 = scalar_lea.vmem %s30_s20, 128  ;;  %p961_p6 = scmp.lt.s32.totalorder %s30_s20, %s30_s20 }
  0x2d   :  { %p957_p5 = scmp.ne.s32.totalorder %s30_s20, %s956_s24  ;;  %p962_p7 = scmp.lt.s32.totalorder %s956_s24, %s956_s24 }
  0x2f   :  { %p963_p8 = por %p962_p7, %p961_p6 }
  0x31   :  { %p964_p9 = pnand %p963_p8, %p957_p5 }
  0x33   :  { %967 = shalt.err (!%p964_p9)
}
  0x34   :  { %32 = dma.hbm_to_vmem [thread:$0]  %s1301_s0, 128, %s30_s20, [#allocation3]  }
  0x35   :  { %s1071_s14 = smov [#allocation7]   ;;  %s1072_s25 = smov [#allocation10]  }
  0x36   :  { %s53_s18 = sshll.u32 %s1071_s14, 4  ;;  %s75_s26 = sshll.u32 %s1072_s25, 4  ;;  %s54_s18 = int_to_ptr.vmem [resolvable:$true] %s53_s18  ;;  %s76_s26 = int_to_ptr.vmem [resolvable:$true] %s75_s26 }
  0x37   :  { %s968_s2 = scalar_lea.hbm %s1304_s3, 16 }
  0x38   :  { %p969_p10 = scmp.ne.s32.totalorder %s1304_s3, %s968_s2  ;;  %p972_p11 = scmp.lt.u32.totalorder %s968_s2, %s1304_s3 }
  0x3a   :  { %p974_p12 = pnand %p972_p11, %p969_p10 }
  0x3c   :  { %977 = shalt.err (!%p974_p12)
}
  0x3d   :  { %s978_s0 = scalar_lea.vmem %s54_s18, 16  ;;  %s982_s20 = scalar_lea.vmem %s54_s18, 32 }
  0x3e   :  { %p979_p13 = scmp.ne.s32.totalorder %s54_s18, %s978_s0  ;;  %p983_p0 = scmp.lt.s32.totalorder %s54_s18, %s54_s18 }
  0x3f   :  { %p984_p1 = scmp.lt.s32.totalorder %s982_s20, %s978_s0 }
  0x41   :  { %p985_p2 = por %p984_p1, %p983_p0 }
  0x43   :  { %p986_p3 = pnand %p985_p2, %p979_p13 }
  0x45   :  { %989 = shalt.err (!%p986_p3)
}
  0x46   :  { %56 = dma.hbm_to_vmem [thread:$0]  %s1304_s3, 16, %s54_s18, [#allocation6]  }
  0x47   :  { %s990_s23 = scalar_lea.hbm %s1306_s5, 16 }
  0x48   :  { %p991_p4 = scmp.ne.s32.totalorder %s1306_s5, %s990_s23  ;;  %p994_p5 = scmp.lt.u32.totalorder %s990_s23, %s1306_s5 }
  0x4a   :  { %p996_p6 = pnand %p994_p5, %p991_p4 }
  0x4c   :  { %999 = shalt.err (!%p996_p6)
}
  0x4d   :  { %s1000_s25 = scalar_lea.vmem %s76_s26, 16  ;;  %s1004_s27 = scalar_lea.vmem %s76_s26, 32 }
  0x4e   :  { %p1001_p7 = scmp.ne.s32.totalorder %s76_s26, %s1000_s25  ;;  %p1005_p8 = scmp.lt.s32.totalorder %s76_s26, %s76_s26 }
  0x4f   :  { %p1006_p9 = scmp.lt.s32.totalorder %s1004_s27, %s1000_s25 }
  0x51   :  { %p1007_p10 = por %p1006_p9, %p1005_p8 }
  0x53   :  { %p1008_p11 = pnand %p1007_p10, %p1001_p7 }
  0x55   :  { %1011 = shalt.err (!%p1008_p11)
}
  0x56   :  { %78 = dma.hbm_to_vmem [thread:$0]  %s1306_s5, 16, %s76_s26, [#allocation9]  }
  0x57   :  { %s1073_s28 = smov [#allocation11]   ;;  %s1012_s30 = scalar_lea.hbm %s1307_s6, 2048 }
  0x58   :  { %s84_s2 = sshll.u32 %s1073_s28, 4  ;;  %p1013_p12 = scmp.ne.s32.totalorder %s1307_s6, %s1012_s30  ;;  %s85_s2 = int_to_ptr.vmem [resolvable:$true] %s84_s2 }
  0x59   :  { %p1016_p13 = scmp.lt.u32.totalorder %s1012_s30, %s1307_s6 }
  0x5b   :  { %p1018_p0 = pnand %p1016_p13, %p1013_p12 }
  0x5d   :  { %1021 = shalt.err (!%p1018_p0)
}
  0x5e   :  { %s1022_s17 = scalar_lea.vmem %s85_s2, 2048  ;;  %p1027_p2 = scmp.lt.s32.totalorder %s85_s2, %s85_s2 }
  0x5f   :  { %p1023_p1 = scmp.ne.s32.totalorder %s85_s2, %s1022_s17  ;;  %p1028_p3 = scmp.lt.s32.totalorder %s1022_s17, %s1022_s17 }
  0x61   :  { %p1029_p4 = por %p1028_p3, %p1027_p2 }
  0x63   :  { %p1030_p5 = pnand %p1029_p4, %p1023_p1 }
  0x65   :  { %1033 = shalt.err (!%p1030_p5)
}
  0x66   :  { %s1074_s5 = smov 128   ;;  %s1075_s26 = smov 8  }
  0x67   :  { %90 = dma.hbm_to_vmem [thread:$0]  %s1307_s6, 2048, %s85_s2, [#allocation12], %s1074_s5, %s1074_s5, %s1075_s26  }
  0x68   :  { %1056 = dma.done.wait [#allocation3], 128  }
  0x69   :  { %1057 = vsyncadd [#allocation3], 4294967168 }
  0x6a   :  { %1058 = dma.done.wait [#allocation6], 1040  }
  0x6b   :  { %1059 = vsyncadd [#allocation6], 4294966256 }
  0x6c   :  { %1060 = dma.done.wait [#allocation9], 1040  }
  0x6d   :  { %1061 = vsyncadd [#allocation9], 4294966256 }
  0x6e   :  { %1062 = dma.done.wait [#allocation12], 2048  }
  0x6f   :  { %1063 = vsyncadd [#allocation12], 4294965248  ;;  %v1076_v0 = vmov 0.0   ;;  %vm1077_vm0 = vmmov 0   ;;  %v834_v1 = vld [vmem:[#allocation5] sm:$0xff]   ;;  %v835_v2 = vld [vmem:[#allocation5 + $0x8] sm:$0xff]   ;;  %v364_v55 = vlaneseq }
  0x70   :  { %778 = vmatprep.subr.bf16.mxu0 %v1076_v0  ;;  %794 = vmatprep.mubr.msk.bf16.mxu0 %vm1077_vm0, %v1076_v0  ;;  %v836_v3 = vld [vmem:[#allocation5 + $0x10] sm:$0xff]   ;;  %v842_v4 = vld [vmem:[#allocation8] sm:$0xff]   ;;  %v837_v5 = vld [vmem:[#allocation5 + $0x18] sm:$0xff]   ;;  %v1078_v43 = vmov 0   ;;  %vm512_vm1 = vcmask 1043456  }
  0x71   :  { %798 = vmatprep.subr.bf16.mxu1 %v1076_v0  ;;  %814 = vmatprep.mubr.msk.bf16.mxu1 %vm1077_vm0, %v1076_v0  ;;  %v843_v6 = vld [vmem:[#allocation8 + $0x8] sm:$0xff]   ;;  %v838_v7 = vld [vmem:[#allocation5 + $0x20] sm:$0xff]   ;;  %v844_v8 = vld [vmem:[#allocation8 + $0x10] sm:$0xff]   ;;  %v1225_v56 = vshrl.u32 %v364_v55, 7 }
  0x72   :  { %779 = vmatpush3.bf16.msra.mxu0 %v834_v1  ;;  %799 = vmatpush3.bf16.msra.mxu1 %v842_v4  ;;  %v839_v9 = vld [vmem:[#allocation5 + $0x28] sm:$0xff]   ;;  %v845_v10 = vld [vmem:[#allocation8 + $0x18] sm:$0xff]   ;;  %v840_v11 = vld [vmem:[#allocation5 + $0x30] sm:$0xff]  }
  0x73   :  { %780 = vmatprep.subr.bf16.mxu0 %v1076_v0  ;;  %800 = vmatprep.subr.bf16.mxu1 %v1076_v0  ;;  %v841_v12 = vld [vmem:[#allocation5 + $0x38] sm:$0xff]   ;;  %v846_v15 = vld [vmem:[#allocation8 + $0x20] sm:$0xff]   ;;  %v847_v16 = vld [vmem:[#allocation8 + $0x28] sm:$0xff]   ;;  %v1228_v57 = vsub.s32 1, %v1225_v56 }
  0x74   :  { %v118_v13 = vld [vmem:[#allocation2] sm:$0xff]  ;;  %v850_v19 = vld [vmem:[#allocation11] ss:$8 sps:$4 sm:$0xff]   ;;  %v852_v20 = vld [vmem:[#allocation11 + $0x4] ss:$8 sps:$4 sm:$0xff]   ;;  %832 = vset.pattern.permute.xlu1 %v1078_v43  ;;  %833 = vset.pattern.permute.xlu0 %v1078_v43 }
  0x75   :  { %v119_v14 = vpack.c.bf16 %v118_v13, %v118_v13  ;;  %v848_v17 = vld [vmem:[#allocation8 + $0x30] sm:$0xff]   ;;  %v849_v18 = vld [vmem:[#allocation8 + $0x38] sm:$0xff]   ;;  %v856_v24 = vld [vmem:[#allocation11 + $0x20] ss:$8 sps:$4 sm:$0xff]  }
  0x76   :  { %781 = vmatpush3.bf16.msra.mxu0 %v835_v2  ;;  %801 = vmatpush3.bf16.msra.mxu1 %v843_v6  ;;  %v855_v21 = vld [vmem:[#allocation11 + $0x14] ss:$8 sps:$4 sm:$0xff]   ;;  %v853_v22 = vld [vmem:[#allocation11 + $0x10] ss:$8 sps:$4 sm:$0xff]   ;;  %v858_v23 = vld [vmem:[#allocation11 + $0x24] ss:$8 sps:$4 sm:$0xff]  }
  0x77   :  { %782 = vmatprep.subr.bf16.mxu0 %v1076_v0  ;;  %802 = vmatprep.subr.bf16.mxu1 %v1076_v0  ;;  %v861_v25 = vld [vmem:[#allocation11 + $0x34] ss:$8 sps:$4 sm:$0xff]   ;;  %v859_v26 = vld [vmem:[#allocation11 + $0x30] ss:$8 sps:$4 sm:$0xff]   ;;  %v864_v35 = vld [vmem:[#allocation11 + $0x44] ss:$8 sps:$4 sm:$0xff]  }
  0x78   :  { %v725_v27 = vld [vmem:[#allocation7] ss:$0 sm:$0xff]  ;;  %v862_v36 = vld [vmem:[#allocation11 + $0x40] ss:$8 sps:$4 sm:$0xff]   ;;  %v865_v38 = vld [vmem:[#allocation11 + $0x50] ss:$8 sps:$4 sm:$0xff]  }
  0x79   :  { %v867_v37 = vld [vmem:[#allocation11 + $0x54] ss:$8 sps:$4 sm:$0xff]   ;;  %v870_v39 = vld [vmem:[#allocation11 + $0x64] ss:$8 sps:$4 sm:$0xff]   ;;  %v868_v40 = vld [vmem:[#allocation11 + $0x60] ss:$8 sps:$4 sm:$0xff]  }
  0x7a   :  { %783 = vmatpush3.bf16.msra.mxu0 %v836_v3  ;;  %803 = vmatpush3.bf16.msra.mxu1 %v844_v8  ;;  %v873_v41 = vld [vmem:[#allocation11 + $0x74] ss:$8 sps:$4 sm:$0xff]   ;;  %v871_v42 = vld [vmem:[#allocation11 + $0x70] ss:$8 sps:$4 sm:$0xff]   ;;  %v1238_v2 = vsub.s32 0, %v1225_v56 }
  0x7b   :  { %784 = vmatprep.subr.bf16.mxu0 %v1076_v0  ;;  %804 = vmatprep.subr.bf16.mxu1 %v1076_v0  ;;  %v734_v44 = vld [vmem:[#allocation10] ss:$0 sm:$0xff]  ;;  %v1220_v52 = vld [vmem:[%s1310_s9] sm:$0xf] }
  0x7c   :  { %v516_v53 = vmul.f32 %v1220_v52, %v1220_v52  ;;  %v362_v58 = vld [vmem:[%s1308_s7] sm:$0x3]  ;;  %v548_v8 = vrot.slane %v1220_v52, %v1238_v2 }
  0x7d   :  { %v371_v59 = vrot.slane %v362_v58, %v1228_v57  ;;  %v367_v3 = vrot.slane %v362_v58, %v1238_v2  ;;  %v1244_v4 = vld [vmem:[%s1302_s1] sm:$0xff] }
  0x7e   :  { %785 = vmatpush3.bf16.msra.mxu0 %v837_v5  ;;  %805 = vmatpush3.bf16.msra.mxu1 %v845_v10  ;;  %v517_v54 = vsel %vm512_vm1, %v516_v53, 0.0  ;;  %v621_v53 = vsub.s32 2, %v1225_v56 }
  0x7f   :  { %786 = vmatprep.subr.bf16.mxu0 %v1076_v0  ;;  %806 = vmatprep.subr.bf16.mxu1 %v1076_v0 }
  0x80   :  { %518 = vadd.xlane.f32.xlu1 %v517_v54  ;;  %v622_v58 = vrot.slane %v1220_v52, %v621_v53 }
  0x82   :  { %787 = vmatpush3.bf16.msra.mxu0 %v838_v7  ;;  %807 = vmatpush3.bf16.msra.mxu1 %v846_v15 }
  0x83   :  { %788 = vmatprep.subr.bf16.mxu0 %v1076_v0  ;;  %808 = vmatprep.subr.bf16.mxu1 %v1076_v0 }
  0x86   :  { %789 = vmatpush3.bf16.msra.mxu0 %v839_v9  ;;  %809 = vmatpush3.bf16.msra.mxu1 %v847_v16  ;;  %v508_v9 = vld [vmem:[%s1309_s8] sm:$0xf]  ;;  %s1079_s8 = smov [#allocation13]  }
  0x87   :  { %790 = vmatprep.subr.bf16.mxu0 %v1076_v0  ;;  %810 = vmatprep.subr.bf16.mxu1 %v1076_v0 }
  0x8a   :  { %791 = vmatpush3.bf16.msra.mxu0 %v840_v11  ;;  %811 = vmatpush3.bf16.msra.mxu1 %v848_v17  ;;  %v511_v11 = vmul.f32 %v1220_v52, %v508_v9 }
  0x8b   :  { %792 = vmatprep.subr.bf16.mxu0 %v1076_v0  ;;  %812 = vmatprep.subr.bf16.mxu1 %v1076_v0 }
  0x8c   :  { %v513_v13 = vsel %vm512_vm1, %v511_v11, 0.0 }
  0x8e   :  { %793 = vmatpush3.bf16.msra.mxu0 %v841_v12  ;;  %813 = vmatpush3.bf16.msra.mxu1 %v849_v18 }
  0x8f   :  { %454 = vmatprep.subr.bf16.mxu0 %v852_v20 }
  0x91   :  { %795 = vmatmul.mubr.bf16.vlgmr.msra.gmra.mrb[0].mxu0 %v119_v14  ;;  %v1257_v14 = vld [vmem:[%s1311_s10] sm:$0xf]  ;;  %s709_s10 = sshll.u32 %s1079_s8, 4  ;;  %s710_s10 = int_to_ptr.vmem [resolvable:$true] %s709_s10 }
  0x92   :  { %455 = vmatpush1.bf16.msra.mxu0 %v850_v19  ;;  %486 = vmatprep.mubr.bf16.mxu0 %v1078_v43  ;;  %v555_v15 = vrot.slane %v1257_v14, %v1238_v2  ;;  %s1034_s27 = scalar_lea.vmem %s710_s10, 128  ;;  %p1039_p7 = scmp.lt.s32.totalorder %s710_s10, %s710_s10 }
  0x93   :  { %456 = vmatprep.subr.bf16.mxu0 %v855_v21  ;;  %p1035_p6 = scmp.ne.s32.totalorder %s710_s10, %s1034_s27  ;;  %p1040_p8 = scmp.lt.s32.totalorder %s1034_s27, %s1034_s27 }
  0x95   :  { %p1041_p9 = por %p1040_p8, %p1039_p7 }
  0x96   :  { %457 = vmatpush1.bf16.msra.mxu0 %v853_v22 }
  0x97   :  { %458 = vmatprep.subr.bf16.mxu0 %v858_v23  ;;  %p1042_p10 = pnand %p1041_p9, %p1035_p6 }
  0x9a   :  { %459 = vmatpush1.bf16.msra.mxu0 %v856_v24 }
  0x9b   :  { %460 = vmatprep.subr.bf16.mxu0 %v861_v25 }
  0x9e   :  { %461 = vmatpush1.bf16.msra.mxu0 %v859_v26 }
  0x9f   :  { %462 = vmatprep.subr.bf16.mxu0 %v864_v35 }
  0xa2   :  { %463 = vmatpush1.bf16.msra.mxu0 %v862_v36 }
  0xa3   :  { %464 = vmatprep.subr.bf16.mxu0 %v867_v37 }
  0xa6   :  { %465 = vmatpush1.bf16.msra.mxu0 %v865_v38 }
  0xa7   :  { %466 = vmatprep.subr.bf16.mxu0 %v870_v39 }
  0xaa   :  { %467 = vmatpush1.bf16.msra.mxu0 %v868_v40 }
  0xab   :  { %468 = vmatprep.subr.bf16.mxu0 %v873_v41 }
  0xae   :  { %469 = vmatpush1.bf16.msra.mxu0 %v871_v42 }
 0x164   :  { %v225_v28 = vpop.f32.mrb[0].mxu0 }
 0x165   :  { %v226_v29 = vadd.f32 %v725_v27, %v225_v28  ;;  %v796_v30 = vpop.f32.mrb[1].mxu0 }
 0x166   :  { %v228_v31 = vpop.f32.mrb[2].mxu0 }
 0x167   :  { %874 = vtanh.f32 %v226_v29  ;;  %v797_v32 = vpop.f32.mrb[3].mxu0 }
 0x171   :  { %v875_v33 = vpop.eup %874 }
 0x172   :  { %v232_v34 = vpack.c.bf16 %v875_v33, %v875_v33 }
 0x174   :  { %815 = vmatmul.mubr.bf16.vlgmr.msra.gmra.mrb[0].mxu1 %v232_v34  ;;  %v519_v34 = vpop.xlane.xlu1 %518 }
 0x247   :  { %v338_v45 = vpop.f32.mrb[0].mxu1 }
 0x248   :  { %v339_v46 = vadd.f32 %v734_v44, %v338_v45  ;;  %v816_v47 = vpop.f32.mrb[1].mxu1  ;;  %v585_v44 = vrot.slane %v1220_v52, %v1228_v57 }
 0x249   :  { %v341_v48 = vpop.f32.mrb[2].mxu1  ;;  %v592_v47 = vrot.slane %v1257_v14, %v1228_v57 }
 0x24a   :  { %876 = vtanh.f32 %v339_v46  ;;  %v817_v49 = vpop.f32.mrb[3].mxu1 }
 0x254   :  { %v877_v50 = vpop.eup %876 }
 0x255   :  { %v345_v51 = vpack.c.bf16 %v877_v50, %v877_v50 }
 0x257   :  { %487 = vmatmul.mubr.bf16.vlgmr.msra.gmra.mrb[4].mxu0 %v345_v51 }
 0x32a   :  { %v488_v60 = vpop.f32.mrb[4].mxu0 }
 0x32b   :  { %v490_v61 = vpop.f32.mrb[5].mxu0  ;;  %v489_v6 = vadd.f32 %v488_v60, %v367_v3 }
 0x32c   :  { %v1234_v62 = vadd.f32 %v490_v61, %v371_v59  ;;  %v492_v63 = vpop.f32.mrb[6].mxu0  ;;  %v629_v61 = vrot.slane %v1257_v14, %v621_v53 }
 0x32d   :  { %v493_v0 = vpop.f32.mrb[7].mxu0 }
 0x32e   :  { %v496_v1 = vmul.f32 1.442695, %v1234_v62 }
 0x330   :  { %878 = vpow2.f32 %v496_v1 }
 0x33a   :  { %v879_v5 = vpop.eup %878 }
 0x33b   :  { %v498_v7 = vmul.f32 %v879_v5, %v1244_v4  ;;  %v658_v5 = vsub.s32 3, %v1225_v56 }
 0x33d   :  { %v499_v10 = vadd.f32 %v498_v7, %v489_v6 }
 0x33f   :  { %v549_v12 = vmul.f32 %v548_v8, %v499_v10  ;;  %v659_v8 = vrot.slane %v1220_v52, %v658_v5 }
 0x341   :  { %550 = vadd.xlane.f32.xlu0 %v549_v12 }
 0x345   :  { %514 = vadd.xlane.f32.xlu0 %v513_v13  ;;  %v503_v13 = vmul.f32 %v1244_v4, %v1244_v4 }
 0x3ce   :  { %v551_v16 = vpop.xlane.xlu0 %550 }
 0x3cf   :  { %v556_v17 = vadd.f32 %v555_v15, %v551_v16  ;;  %v666_v15 = vrot.slane %v1257_v14, %v658_v5 }
 0x3d1   :  { %880 = vtanh.f32 %v556_v17 }
 0x3d2   :  { %v515_v19 = vpop.xlane.xlu0 %514 }
 0x3d3   :  { %v521_v20 = vand.u32 2147483647, %v515_v19  ;;  %v520_v31 = vmax.f32 %v515_v19, 0.0 }
 0x3d5   :  { %v522_v21 = vsub.f32 0.0, %v521_v20 }
 0x3d7   :  { %v523_v22 = vmul.f32 1.442695, %v522_v21 }
 0x3d9   :  { %882 = vpow2.f32 %v523_v22 }
 0x3db   :  { %v1261_v18 = vpop.eup %880 }
 0x3dc   :  { %564 = vperm.xlu1 %832, %v1261_v18   ;;  %v569_v4 = vmul.f32 %v1261_v18, %v1261_v18 }
 0x3e3   :  { %v883_v23 = vpop.eup %882 }
 0x3e4   :  { %v525_v24 = vadd.f32 1.0, %v883_v23  ;;  %v528_v25 = vmul.f32 -0.5, %v883_v23  ;;  %v531_v28 = vand.u32 2147483647, %v883_v23 }
 0x3e6   :  { %884 = vlog2.f32 %v525_v24  ;;  %v529_v26 = vadd.f32 1.0, %v528_v25  ;;  %vm532_vm2 = vcmp.lt.f32.partialorder %v531_v28, 0.0004427343  ;;  %v570_v25 = vsub.f32 1.0, %v569_v4 }
 0x3e7   :  { %886 = vrcp.f32 %v519_v34 }
 0x3e8   :  { %v530_v30 = vmul.f32 %v883_v23, %v529_v26 }
 0x3f0   :  { %v885_v27 = vpop.eup %884 }
 0x3f1   :  { %v527_v29 = vmul.f32 0.6931472, %v885_v27  ;;  %v887_v38 = vpop.eup %886 }
 0x3f3   :  { %v533_v32 = vsel %vm532_vm2, %v530_v30, %v527_v29 }
 0x3f4   :  { %v534_v33 = vadd.f32 %v533_v32, %v520_v31 }
 0x3f6   :  { %v759_v35 = vadd.f32 -1.0, %v534_v33 }
 0x3f8   :  { %v536_v36 = vsub.f32 %v759_v35, %v515_v19 }
 0x3fa   :  { %v537_v37 = vmul.f32 %v536_v36, %v1220_v52 }
 0x3fc   :  { %v539_v39 = vmul.f32 %v887_v38, %v537_v37 }
 0x3fe   :  { %v540_v40 = vadd.f32 %v539_v39, %v508_v9 }
 0x400   :  { %v561_v41 = vrot.slane %v540_v40, %v1238_v2  ;;  %v598_v51 = vrot.slane %v540_v40, %v1228_v57  ;;  %v635_v3 = vrot.slane %v540_v40, %v621_v53  ;;  %v541_v11 = vmul.f32 %v540_v40, %v1220_v52 }
 0x401   :  { %v672_v19 = vrot.slane %v540_v40, %v658_v5 }
 0x402   :  { %v542_v12 = vsel %vm512_vm1, %v541_v11, 0.0 }
 0x45b   :  { %v565_v42 = vpop.permute.xlu1 %564 }
 0x45c   :  { %v567_v43 = vmul.f32 %v565_v42, %v561_v41 }
 0x45e   :  { %v568_v45 = vadd.f32 %v567_v43, %v499_v10 }
 0x460   :  { %v586_v46 = vmul.f32 %v585_v44, %v568_v45 }
 0x462   :  { %587 = vadd.xlane.f32.xlu0 %v586_v46 }
 0x4ef   :  { %v588_v48 = vpop.xlane.xlu0 %587 }
 0x4f0   :  { %v593_v49 = vadd.f32 %v592_v47, %v588_v48 }
 0x4f2   :  { %888 = vtanh.f32 %v593_v49 }
 0x4fc   :  { %v889_v50 = vpop.eup %888 }
 0x4fd   :  { %601 = vperm.xlu0 %833, %v889_v50   ;;  %v606_v24 = vmul.f32 %v889_v50, %v889_v50 }
 0x57c   :  { %v602_v54 = vpop.permute.xlu0 %601 }
 0x57d   :  { %v604_v55 = vmul.f32 %v602_v54, %v598_v51 }
 0x57f   :  { %v605_v59 = vadd.f32 %v604_v55, %v568_v45 }
 0x581   :  { %v623_v60 = vmul.f32 %v622_v58, %v605_v59 }
 0x583   :  { %624 = vadd.xlane.f32.xlu1 %v623_v60 }
 0x610   :  { %v625_v63 = vpop.xlane.xlu1 %624 }
 0x611   :  { %v630_v0 = vadd.f32 %v629_v61, %v625_v63 }
 0x613   :  { %890 = vtanh.f32 %v630_v0 }
 0x61d   :  { %v891_v1 = vpop.eup %890 }
 0x61e   :  { %638 = vperm.xlu0 %833, %v891_v1   ;;  %v643_v26 = vmul.f32 %v891_v1, %v891_v1 }
 0x620   :  { %v644_v31 = vsub.f32 1.0, %v643_v26 }
 0x69d   :  { %v639_v6 = vpop.permute.xlu0 %638 }
 0x69e   :  { %v641_v7 = vmul.f32 %v639_v6, %v635_v3 }
 0x6a0   :  { %v642_v9 = vadd.f32 %v641_v7, %v605_v59 }
 0x6a2   :  { %v660_v10 = vmul.f32 %v659_v8, %v642_v9 }
 0x6a4   :  { %661 = vadd.xlane.f32.xlu1 %v660_v10 }
 0x6a8   :  { %543 = vadd.xlane.f32.xlu1 %v542_v12 }
 0x6ac   :  { %504 = vadd.xlane.f32.xlu1 %v503_v13 }
 0x731   :  { %v662_v16 = vpop.xlane.xlu1 %661 }
 0x732   :  { %v667_v56 = vadd.f32 %v666_v15, %v662_v16 }
 0x734   :  { %892 = vtanh.f32 %v667_v56 }
 0x735   :  { %v544_v23 = vpop.xlane.xlu1 %543 }
 0x736   :  { %v574_v14 = vrot.slane %v544_v23, %v1238_v2  ;;  %v611_v28 = vrot.slane %v544_v23, %v1228_v57  ;;  %v648_v30 = vrot.slane %v544_v23, %v621_v53  ;;  %v685_v36 = vrot.slane %v544_v23, %v658_v5 }
 0x738   :  { %v575_v29 = vmul.f32 %v574_v14, %v570_v25  ;;  %v649_v35 = vmul.f32 %v648_v30, %v644_v31 }
 0x73a   :  { %v576_v34 = vadd.f32 1.0, %v575_v29  ;;  %v650_v2 = vadd.f32 1.0, %v649_v35 }
 0x73c   :  { %v577_v18 = vand.u32 2147483647, %v576_v34 }
 0x73e   :  { %v893_v17 = vpop.eup %892 }
 0x73f   :  { %675 = vperm.xlu0 %833, %v893_v17   ;;  %v680_v27 = vmul.f32 %v893_v17, %v893_v17 }
 0x741   :  { %v681_v32 = vsub.f32 1.0, %v680_v27 }
 0x743   :  { %v686_v38 = vmul.f32 %v685_v36, %v681_v32 }
 0x75e   :  { %500 = vadd.xlane.f32.xlu0 %v1234_v62  ;;  %v607_v62 = vsub.f32 1.0, %v606_v24 }
 0x760   :  { %v612_v33 = vmul.f32 %v611_v28, %v607_v62 }
 0x762   :  { %v613_v37 = vadd.f32 1.0, %v612_v33 }
 0x7be   :  { %v676_v20 = vpop.permute.xlu0 %675 }
 0x7bf   :  { %v678_v52 = vmul.f32 %v676_v20, %v672_v19 }
 0x7c1   :  { %v679_v21 = vadd.f32 %v678_v52, %v642_v9 }
 0x7c3   :  { %698 = vst [vmem:[#allocation13] sm:$0xff] %v679_v21  ;;  %v693_v22 = vmul.f32 %v679_v21, %v679_v21 }
 0x7c5   :  { %694 = vadd.xlane.f32.xlu1 %v693_v22 }
 0x7c6   :  { %1045 = shalt.err (!%p1042_p10)
}
 0x7c7   :  { %s1046_s28 = scalar_lea.hbm %s1312_s11, 128 }
 0x7c8   :  { %p1047_p11 = scmp.ne.s32.totalorder %s1312_s11, %s1046_s28  ;;  %p1050_p12 = scmp.lt.u32.totalorder %s1046_s28, %s1312_s11 }
 0x7ca   :  { %p1052_p13 = pnand %p1050_p12, %p1047_p11 }
 0x7cc   :  { %1055 = shalt.err (!%p1052_p13)
}
 0x7cd   :  { %712 = dma.vmem_to_hbm [thread:$0]  %s710_s10, 128, %s1312_s11, [#allocation4]   ;;  %v614_v57 = vand.u32 2147483647, %v613_v37  ;;  %v687_v39 = vadd.f32 1.0, %v686_v38  ;;  %v505_v46 = vpop.xlane.xlu1 %504  ;;  %vm699_vm3 = vcmask 7168  }
 0x7ce   :  { %v578_v40 = vadd.f32 1e-08, %v577_v18  ;;  %v651_v41 = vand.u32 2147483647, %v650_v2  ;;  %v506_v47 = vmul.f32 0.5, %v505_v46  ;;  %vm701_vm4 = vcmask 15360  }
 0x7cf   :  { %v615_v42 = vadd.f32 1e-08, %v614_v57  ;;  %v688_v43 = vand.u32 2147483647, %v687_v39 }
 0x7d0   :  { %v652_v44 = vadd.f32 1e-08, %v651_v41  ;;  %894 = vlog2.f32 %v578_v40 }
 0x7d1   :  { %896 = vlog2.f32 %v615_v42  ;;  %v689_v45 = vadd.f32 1e-08, %v688_v43 }
 0x7d2   :  { %898 = vlog2.f32 %v652_v44 }
 0x7d3   :  { %900 = vlog2.f32 %v689_v45 }
 0x7da   :  { %v895_v48 = vpop.eup %894 }
 0x7db   :  { %v897_v51 = vpop.eup %896  ;;  %v580_v53 = vmul.f32 0.6931472, %v895_v48 }
 0x7dc   :  { %v899_v55 = vpop.eup %898  ;;  %v617_v58 = vmul.f32 0.6931472, %v897_v51 }
 0x7dd   :  { %v901_v60 = vpop.eup %900  ;;  %v654_v61 = vmul.f32 0.6931472, %v899_v55 }
 0x7de   :  { %v691_v1 = vmul.f32 0.6931472, %v901_v60 }
 0x7eb   :  { %v501_v49 = vpop.xlane.xlu0 %500 }
 0x7ec   :  { %v502_v50 = vsub.f32 -117.62413, %v501_v49 }
 0x7ee   :  { %v507_v54 = vsub.f32 %v502_v50, %v506_v47 }
 0x7f0   :  { %v581_v59 = vsub.f32 %v507_v54, %v580_v53 }
 0x7f2   :  { %v618_v63 = vsub.f32 %v581_v59, %v617_v58 }
 0x7f4   :  { %v655_v0 = vsub.f32 %v618_v63, %v654_v61 }
 0x7f6   :  { %v692_v3 = vsub.f32 %v655_v0, %v691_v1 }
 0x852   :  { %v695_v5 = vpop.xlane.xlu1 %694 }
 0x853   :  { %v696_v6 = vmul.f32 0.5, %v695_v5 }
 0x855   :  { %v697_v7 = vsub.f32 -117.62413, %v696_v6 }
 0x857   :  { %v700_v8 = vsel %vm699_vm3, %v692_v3, %v697_v7 }
 0x858   :  { %702 = vst.msk [vmem:[%s1313_s12] sm:$0xff] %vm701_vm4, %v700_v8 }
 0x859   :  { %1064 = dma.done.wait [#allocation4], 128  }
 0x85a   :  { %1065 = vsyncadd [#allocation4], 4294967168 }
 0x85b   :  { %720 = vsyncpa [#allocation3], 1 }
 0x85c   :  { %721 = vsyncpa [#allocation6], 1 }
 0x85d   :  { %722 = vsyncpa [#allocation9], 1 }
 0x85e   :  { %723 = vsyncpa [#allocation12], 1 }
 0x85f   :  { %724 = vsyncpa [#allocation4], 1 }

</bundles_post_ra>
